<compile_context>
chip_gen: v6e
topology: v6e:2x2x1
jax: 0.10.0
libtpu: 0.0.40
codegen_flags: <defaults>
</compile_context>

<pallas_src>
import functools

import jax
import jax.numpy as jnp
from jax.experimental import pallas as pl
from jax.experimental.pallas import tpu as pltpu


def _ceil_to(x, m):
    return (x + m - 1) // m * m


# ----------------------------------------------------------------------------
# Hardware-aware sizing (explicit VMEM limit; v7x has only 64 MiB per core).
# ----------------------------------------------------------------------------
def _vmem_capacity_bytes():
    cap = 64 * 1024 * 1024                      # conservative (v7x-sized)
    try:
        cap = int(pltpu.get_tpu_info().vmem_capacity_bytes)
    except Exception:
        pass
    try:
        if 'v7' in jax.devices()[0].device_kind.lower():
            cap = min(cap, 64 * 1024 * 1024)
    except Exception:
        pass
    return cap


def _is_multi_core_tc():
    try:
        kind = jax.devices()[0].device_kind.lower()
        return ('v7' in kind) or ('v4' in kind) or ('v5p' in kind)
    except Exception:
        return False


_VMEM_LIMIT = int(min(_vmem_capacity_bytes(), 128 * 1024 * 1024)) * 3 // 4
_TILE_BUDGET = _VMEM_LIMIT * 2 // 3
_MULTI_CORE = _is_multi_core_tc()


# ----------------------------------------------------------------------------
# Fused matmul kernels (im2col / 1x1 convs): bf16 MXU, f32 accumulation,
# fused scale/shift (+residual) (+ReLU) epilogue.
# ----------------------------------------------------------------------------
def _mm_fused_kernel(a_ref, b_ref, s_ref, h_ref, o_ref, acc_ref, *, relu):
    @pl.when(pl.program_id(2) == 0)
    def _():
        acc_ref[...] = jnp.zeros_like(acc_ref)

    acc_ref[...] += jnp.dot(a_ref[...], b_ref[...],
                            preferred_element_type=jnp.float32)

    @pl.when(pl.program_id(2) == pl.num_programs(2) - 1)
    def _():
        y = acc_ref[...] * s_ref[...] + h_ref[...]
        if relu:
            y = jnp.maximum(y, 0.0)
        o_ref[...] = y.astype(o_ref.dtype)


def _mm_fused_res_kernel(a_ref, b_ref, s_ref, h_ref, r_ref, o_ref, acc_ref, *,
                         relu):
    @pl.when(pl.program_id(2) == 0)
    def _():
        acc_ref[...] = jnp.zeros_like(acc_ref)

    acc_ref[...] += jnp.dot(a_ref[...], b_ref[...],
                            preferred_element_type=jnp.float32)

    @pl.when(pl.program_id(2) == pl.num_programs(2) - 1)
    def _():
        y = (acc_ref[...] * s_ref[...] + h_ref[...]
             + r_ref[...].astype(jnp.float32))
        if relu:
            y = jnp.maximum(y, 0.0)
        o_ref[...] = y.astype(o_ref.dtype)


def _largest_divisor_leq(k, cap):
    """Largest divisor of k that is <= cap (bounded; fixes old fallback)."""
    if k <= cap:
        return k
    for cand in (4096, 3072, 2048, 1536, 1024, 768, 512, 384, 256, 128):
        if cand <= cap and k % cand == 0:
            return cand
    for t in range(min(cap, k), 0, -1):
        if k % t == 0:
            return t
    return k


def _matmul_tiles(M, K, N):
    tm = min(512, _ceil_to(M, 16))
    tn = min(N, 1024) if N % 128 == 0 else N
    cap = 4096
    while True:
        tk = _largest_divisor_leq(K, cap)
        est = 2 * 2 * (tm * tk + tk * tn + tm * tn) + 4 * tm * tn
        if est <= _TILE_BUDGET:
            break
        if tk > 128:
            cap = max(128, tk // 2)
        elif tn > 256 and N % (tn // 2) == 0:
            tn //= 2
        elif tm > 64:
            tm = _ceil_to(tm // 2, 16)
        else:
            break
    if _MULTI_CORE and M >= 64:
        mt, nt = -(-M // tm), -(-N // tn)
        if mt * nt < 2:                      # keep both TensorCores busy (v7x)
            tm = _ceil_to(-(-M // 2), 16)
    return tm, tn, tk


def matmul_fused(a, b, scale, shift, residual=None, relu=False,
                 out_dtype=jnp.bfloat16):
    """(M,K)@(K,N) with fused y = acc*scale + shift (+res) (+ReLU)."""
    M, K = a.shape
    K2, N = b.shape
    assert K == K2
    a = a.astype(jnp.bfloat16)
    b = b.astype(jnp.bfloat16)
    scale = scale.reshape(1, N).astype(jnp.float32)
    shift = shift.reshape(1, N).astype(jnp.float32)

    tm, tn, tk = _matmul_tiles(M, K, N)
    grid = (pl.cdiv(M, tm), pl.cdiv(N, tn), K // tk)

    in_specs = [
        pl.BlockSpec((tm, tk), lambda i, j, k: (i, k)),
        pl.BlockSpec((tk, tn), lambda i, j, k: (k, j)),
        pl.BlockSpec((1, tn), lambda i, j, k: (0, j)),
        pl.BlockSpec((1, tn), lambda i, j, k: (0, j)),
    ]
    args = [a, b, scale, shift]
    if residual is None:
        kernel = functools.partial(_mm_fused_kernel, relu=relu)
    else:
        kernel = functools.partial(_mm_fused_res_kernel, relu=relu)
        in_specs.append(pl.BlockSpec((tm, tn), lambda i, j, k: (i, j)))
        args.append(residual.astype(jnp.bfloat16))

    return pl.pallas_call(
        kernel,
        out_shape=jax.ShapeDtypeStruct((M, N), out_dtype),
        grid_spec=pltpu.PrefetchScalarGridSpec(
            num_scalar_prefetch=0,
            grid=grid,
            in_specs=in_specs,
            out_specs=pl.BlockSpec((tm, tn), lambda i, j, k: (i, j)),
            scratch_shapes=[pltpu.VMEM((tm, tn), jnp.float32)]),
        compiler_params=pltpu.CompilerParams(
            dimension_semantics=("parallel", "parallel", "arbitrary"),
            vmem_limit_bytes=_VMEM_LIMIT),
    )(*args)


# ----------------------------------------------------------------------------
# Direct 3x3 conv (stride 1, padding == dilation): no HBM im2col.
# The padded NHWC activation is flattened to (Hp*Wp, Cin); every kernel tap is
# a contiguous row-window of that matrix, copied into a VMEM patch buffer and
# contracted in a single MXU matmul per Cin tile.  The Wp-Wo wrap columns per
# output row are garbage and sliced off in the wrapper.
# ----------------------------------------------------------------------------
def _direct3x3_kernel(x_ref, w_ref, s_ref, h_ref, o_ref, patch_ref, acc_ref,
                      *, dilation, Wp, relu):
    k = pl.program_id(2)

    @pl.when(k == 0)
    def _():
        acc_ref[...] = jnp.zeros_like(acc_ref)

    M2 = patch_ref.shape[0]
    ck = x_ref.shape[-1]
    for t in range(9):                                  # build patch in VMEM
        off = (t // 3) * dilation * Wp + (t % 3) * dilation
        patch_ref[:, t * ck:(t + 1) * ck] = x_ref[0, off:off + M2, :]

    acc_ref[...] += jnp.dot(patch_ref[...],
                            w_ref[...].reshape(9 * ck, w_ref.shape[-1]),
                            preferred_element_type=jnp.float32)

    @pl.when(k == pl.num_programs(2) - 1)
    def _():
        y = acc_ref[...] * s_ref[...] + h_ref[...]
        if relu:
            y = jnp.maximum(y, 0.0)
        o_ref[0] = y.astype(o_ref.dtype)


def _direct_tiles(Htot, M2, Cin, Cout):
    tn = Cout
    if _MULTI_CORE and Cout >= 256:
        tn = Cout // 2        # >=2 output-channel tiles -> both cores busy
    for ck in [c for c in (Cin, 1024, 512, 256, 128)
               if c <= Cin and Cin % c == 0]:
        est = (2 * Htot * ck * 2          # activation block (double-buffered)
               + 2 * 9 * ck * tn * 2      # weight block
               + 2 * M2 * tn * 2          # output block
               + M2 * tn * 4              # f32 accumulator
               + M2 * 9 * ck * 2)         # in-VMEM patch scratch
        if est <= _TILE_BUDGET:
            return tn, ck
    return None


def _direct_conv3x3(x, p, dilation, relu, out_dtype):
    N, H, W, Cin = x.shape
    Cout = p['w4'].shape[-1]
    d = dilation
    Ho, Wo = H, W
    Wp = W + 2 * d
    Hp = H + 2 * d + 1              # +1 zero row absorbs the flattened overrun
    Htot = Hp * Wp
    M2 = Ho * Wp
    tiles = _direct_tiles(Htot, M2, Cin, Cout)
    if tiles is None:
        return None                 # oversized feature map -> im2col fallback
    tn, ck = tiles

    xf = jnp.pad(x, ((0, 0), (d, d + 1), (d, d), (0, 0))).reshape(N, Htot, Cin)
    w = p['w4'].reshape(9, Cin, Cout)
    scale = p['scale'].reshape(1, Cout).astype(jnp.float32)
    shift = p['shift'].reshape(1, Cout).astype(jnp.float32)

    kernel = functools.partial(_direct3x3_kernel, dilation=d, Wp=Wp, relu=relu)
    out = pl.pallas_call(
        kernel,
        out_shape=jax.ShapeDtypeStruct((N, M2, Cout), out_dtype),
        grid_spec=pltpu.PrefetchScalarGridSpec(
            num_scalar_prefetch=0,
            grid=(N, Cout // tn, Cin // ck),
            in_specs=[
                pl.BlockSpec((1, Htot, ck), lambda n, j, k: (n, 0, k)),
                pl.BlockSpec((9, ck, tn), lambda n, j, k: (0, k, j)),
                pl.BlockSpec((1, tn), lambda n, j, k: (0, j)),
                pl.BlockSpec((1, tn), lambda n, j, k: (0, j)),
            ],
            out_specs=pl.BlockSpec((1, M2, tn), lambda n, j, k: (n, 0, j)),
            scratch_shapes=[pltpu.VMEM((M2, 9 * ck), jnp.bfloat16),
                            pltpu.VMEM((M2, tn), jnp.float32)]),
        compiler_params=pltpu.CompilerParams(
            dimension_semantics=("parallel", "parallel", "arbitrary"),
            vmem_limit_bytes=_VMEM_LIMIT),
    )(xf, w, scale, shift)
    return out.reshape(N, Ho, Wp, Cout)[:, :, :Wo, :]


# ----------------------------------------------------------------------------
# MaxPool 3x3 / stride 2 / pad 1: even/odd parity planes, unit-stride slices.
# ----------------------------------------------------------------------------
def _maxpool_kernel(ee_ref, eo_ref, oe_ref, oo_ref, o_ref):
    Ho, Wo = o_ref.shape[1], o_ref.shape[2]
    v = oo_ref[0]
    for r in (0, 1):
        for c in (0, 1):
            v = jnp.maximum(v, ee_ref[0, r:r + Ho, c:c + Wo, :])
    for r in (0, 1):
        v = jnp.maximum(v, eo_ref[0, r:r + Ho, :, :])
    for c in (0, 1):
        v = jnp.maximum(v, oe_ref[0, :, c:c + Wo, :])
    o_ref[0] = v


def maxpool2d_3x3s2p1(x):
    N, H, W, C = x.shape
    Ho = (H - 1) // 2 + 1
    Wo = (W - 1) // 2 + 1
    isz = jnp.dtype(x.dtype).itemsize
    plane = ((Ho + 1) * (Wo + 1) + (Ho + 1) * Wo + Ho * (Wo + 1) + Ho * Wo) * C * isz
    if 2 * (plane + Ho * Wo * C * isz) > _TILE_BUDGET:
        # TODO(synk): halo-tiled Pallas max-pool for very large feature maps.
        return jax.lax.reduce_window(
            x, jnp.array(-jnp.inf, x.dtype), jax.lax.max,
            (1, 3, 3, 1), (1, 2, 2, 1), ((0, 0), (1, 1), (1, 1), (0, 0)))

    xp = jnp.pad(x, ((0, 0), (1, 1), (1, 1), (0, 0)),
                 constant_values=-jnp.inf)
    ee = xp[:, 0::2, 0::2, :][:, :Ho + 1, :Wo + 1, :]
    eo = xp[:, 0::2, 1::2, :][:, :Ho + 1, :Wo, :]
    oe = xp[:, 1::2, 0::2, :][:, :Ho, :Wo + 1, :]
    oo = xp[:, 1::2, 1::2, :][:, :Ho, :Wo, :]
    return pl.pallas_call(
        _maxpool_kernel,
        out_shape=jax.ShapeDtypeStruct((N, Ho, Wo, C), x.dtype),
        grid=(N,),
        in_specs=[pl.BlockSpec((1, Ho + 1, Wo + 1, C), lambda n: (n, 0, 0, 0)),
                  pl.BlockSpec((1, Ho + 1, Wo, C), lambda n: (n, 0, 0, 0)),
                  pl.BlockSpec((1, Ho, Wo + 1, C), lambda n: (n, 0, 0, 0)),
                  pl.BlockSpec((1, Ho, Wo, C), lambda n: (n, 0, 0, 0))],
        out_specs=pl.BlockSpec((1, Ho, Wo, C), lambda n: (n, 0, 0, 0)),
        compiler_params=pltpu.CompilerParams(
            dimension_semantics=("parallel",),
            vmem_limit_bytes=_VMEM_LIMIT),
    )(ee, eo, oe, oo)


# ----------------------------------------------------------------------------
# Bilinear upsample (align_corners=False), single f32 Pallas kernel -> NCHW.
# ----------------------------------------------------------------------------
def _interp_matrix(out_size, in_size):
    if in_size == out_size:
        return jnp.eye(out_size, dtype=jnp.float32)
    scale = in_size / out_size
    i = jnp.arange(out_size, dtype=jnp.float32)
    src = jnp.maximum((i + 0.5) * scale - 0.5, 0.0)
    x0 = jnp.minimum(jnp.floor(src).astype(jnp.int32), in_size - 1)
    x1 = jnp.minimum(x0 + 1, in_size - 1)
    frac = src - x0.astype(jnp.float32)
    m = jnp.zeros((out_size, in_size), jnp.float32)
    rows = jnp.arange(out_size)
    m = m.at[rows, x0].add(1.0 - frac)
    m = m.at[rows, x1].add(frac)
    return m


def _bilinear_kernel(ah_ref, x_ref, awt_ref, o_ref):
    t = jnp.dot(ah_ref[...], x_ref[0], preferred_element_type=jnp.float32)
    o_ref[0] = jnp.dot(t, awt_ref[...], preferred_element_type=jnp.float32)


def bilinear_resize_to_nchw(x_nhwc, H_out, W_out):
    N, h, w, C = x_nhwc.shape
    xm = jnp.transpose(x_nhwc, (0, 3, 1, 2)).astype(jnp.float32)   # (N,C,h,w)
    if h == H_out and w == W_out:
        return xm
    xm = xm.reshape(N * C, h, w)
    ah = _interp_matrix(H_out, h)
    awt = _interp_matrix(W_out, w).T
    out = pl.pallas_call(
        _bilinear_kernel,
        out_shape=jax.ShapeDtypeStruct((N * C, H_out, W_out), jnp.float32),
        grid=(N * C,),
        in_specs=[pl.BlockSpec((H_out, h), lambda i: (0, 0)),
                  pl.BlockSpec((1, h, w), lambda i: (i, 0, 0)),
                  pl.BlockSpec((w, W_out), lambda i: (0, 0))],
        out_specs=pl.BlockSpec((1, H_out, W_out), lambda i: (i, 0, 0)),
        compiler_params=pltpu.CompilerParams(
            dimension_semantics=("parallel",),
            vmem_limit_bytes=_VMEM_LIMIT),
    )(ah, xm, awt)
    return out.reshape(N, C, H_out, W_out)


# ----------------------------------------------------------------------------
# NN building blocks (glue in plain JAX, hot path in Pallas)
# ----------------------------------------------------------------------------
def _im2col(x, kh, kw, stride, padding, dilation):
    N, H, W, Cin = x.shape
    Ho = (H + 2 * padding - dilation * (kh - 1) - 1) // stride + 1
    Wo = (W + 2 * padding - dilation * (kw - 1) - 1) // stride + 1
    if kh == 1 and kw == 1 and padding == 0:
        xs = x if stride == 1 else x[:, ::stride, ::stride, :]
        return xs.reshape(N * Ho * Wo, Cin), Ho, Wo
    xp = jnp.pad(x, ((0, 0), (padding, padding), (padding, padding), (0, 0)))
    cols = []
    for i in range(kh):
        for j in range(kw):
            hi, wj = i * dilation, j * dilation
            cols.append(xp[:, hi:hi + stride * Ho:stride,
                           wj:wj + stride * Wo:stride, :])
    patches = jnp.concatenate(cols, -1).reshape(N * Ho * Wo, kh * kw * Cin)
    return patches, Ho, Wo


def conv_bn(x, p, stride=1, padding=0, dilation=1, residual=None, relu=True,
            out_dtype=jnp.bfloat16):
    """Conv (no bias) + folded BN (+residual) (+ReLU) as one fused kernel."""
    nb = x.shape[0]
    kh, kw = p['kh'], p['kw']
    cout_p = p['w4'].shape[-1]
    if (kh == 3 and kw == 3 and stride == 1 and padding == dilation
            and residual is None):
        y = _direct_conv3x3(x, p, dilation, relu, out_dtype)
        if y is not None:
            return y
    a, Ho, Wo = _im2col(x, kh, kw, stride, padding, dilation)
    w_mat = p['w4'].reshape(kh * kw * p['w4'].shape[2], cout_p)
    r = None if residual is None else residual.reshape(-1, residual.shape[-1])
    out = matmul_fused(a, w_mat, p['scale'], p['shift'],
                       residual=r, relu=relu, out_dtype=out_dtype)
    return out.reshape(nb, Ho, Wo, cout_p)


def bottleneck(x, blk):
    s, d = blk['stride'], blk['dilation']
    identity = x
    out = conv_bn(x, blk['c1'])
    out = conv_bn(out, blk['c2'], stride=s, padding=d, dilation=d)
    if blk['has_down']:
        identity = conv_bn(x, blk['down'], stride=s, relu=False)
    return conv_bn(out, blk['c3'], residual=identity, relu=True)


# ----------------------------------------------------------------------------
# Deterministic parameter construction (fcn_resnet50 shapes, 2 classes).
# Output channels are zero-padded to multiples of 128 (lane-dense stores);
# padded channels carry exactly zero through the whole network.
# ----------------------------------------------------------------------------
def _pad_c(c):
    return 128 if c < 128 else c


def _conv_bn_init(key, cout, cin, kh, kw, eps=1e-5, conv_bias=False):
    cout_p = _pad_c(cout)
    k1, k2 = jax.random.split(key)
    fan_in = cin * kh * kw
    w = jax.random.normal(k1, (kh, kw, cin, cout),
                          jnp.float32) * jnp.sqrt(2.0 / fan_in)
    w = jnp.pad(w, ((0, 0), (0, 0), (0, 0), (0, cout_p - cout)))
    if conv_bias:
        scale = jnp.ones((cout,), jnp.float32)
        shift = jax.random.normal(k2, (cout,), jnp.float32) * 0.01
    else:   # eval-mode BatchNorm folded from running statistics
        gamma = jnp.ones((cout,), jnp.float32)
        beta = jax.random.normal(k2, (cout,), jnp.float32) * 0.01
        mean = jnp.zeros((cout,), jnp.float32)
        var = jnp.ones((cout,), jnp.float32)
        scale = gamma / jnp.sqrt(var + eps)
        shift = beta - mean * scale
    scale = jnp.pad(scale, (0, cout_p - cout), constant_values=1.0)
    shift = jnp.pad(shift, (0, cout_p - cout))
    return dict(w4=w.astype(jnp.bfloat16), scale=scale, shift=shift,
                kh=kh, kw=kw, cout=cout)


def build_params(key):
    keys = iter(jax.random.split(key, 512))
    P = {}
    P['stem'] = _conv_bn_init(next(keys), 64, 3, 7, 7)

    # ResNet50 backbone, replace_stride_with_dilation=[False, True, True]
    layer_cfg = [(64, 3, 1, False), (128, 4, 2, False),
                 (256, 6, 2, True), (512, 3, 2, True)]
    in_real, in_pad, dilation = 64, _pad_c(64), 1
    layers = []
    for planes, blocks, stride, dilate in layer_cfg:
        prev_dilation = dilation
        if dilate:
            dilation *= stride
            stride = 1
        blocks_p = []
        for b in range(blocks):
            s = stride if b == 0 else 1
            d = prev_dilation if b == 0 else dilation
            cin = in_pad if b == 0 else _pad_c(planes * 4)
            blk = {
                'c1': _conv_bn_init(next(keys), planes, cin, 1, 1),
                'c2': _conv_bn_init(next(keys), planes, _pad_c(planes), 3, 3),
                'c3': _conv_bn_init(next(keys), planes * 4, _pad_c(planes), 1, 1),
                'stride': s, 'dilation': d,
                'has_down': (b == 0) and (s != 1 or in_real != planes * 4),
            }
            if blk['has_down']:
                blk['down'] = _conv_bn_init(next(keys), planes * 4, cin, 1, 1)
            blocks_p.append(blk)
        in_real, in_pad = planes * 4, _pad_c(planes * 4)
        layers.append(blocks_p)
    P['layers'] = layers

    # FCNHead(2048): Conv3x3(2048->512,no bias)+BN+ReLU+Dropout(identity),
    # then the replaced classifier[4] = Conv2d(512, 2, 1) with bias.
    P['head1'] = _conv_bn_init(next(keys), 512, 2048, 3, 3)
    P['head2'] = _conv_bn_init(next(keys), 2, 512, 1, 1, conv_bias=True)
    return P


# ----------------------------------------------------------------------------
# Full forward: SegmentationModel(x) -> model(x)['out']
# ----------------------------------------------------------------------------
def segmentation_forward(P, x_nchw):
    x = jnp.transpose(x_nchw, (0, 2, 3, 1)).astype(jnp.bfloat16)  # NHWC bf16
    H, W = x.shape[1], x.shape[2]

    out = conv_bn(x, P['stem'], stride=2, padding=3)
    out = maxpool2d_3x3s2p1(out)
    for blocks in P['layers']:
        for blk in blocks:
            out = bottleneck(out, blk)

    out = conv_bn(out, P['head1'], stride=1, padding=1, dilation=1)
    logits = conv_bn(out, P['head2'], relu=False, out_dtype=jnp.float32)
    logits = logits[..., :P['head2']['cout']]       # drop padded classes -> 2

    # F.interpolate(..., size=(H, W), mode='bilinear', align_corners=False)
    return bilinear_resize_to_nchw(logits, H, W)    # (N, 2, H, W) f32, NCHW


if __name__ == "__main__":
    key = jax.random.PRNGKey(0)
    kp, kx = jax.random.split(key)
    params = build_params(kp)
    x = jax.random.normal(kx, (1, 3, 32, 32), jnp.float32)  # NCHW input

    y = segmentation_forward(params, x)
    y = jax.block_until_ready(y)

    assert y.shape == (1, 2, 32, 32), y.shape
    assert bool(jnp.all(jnp.isfinite(y)))
    print("KERNEL_OK")
</pallas_src>

<mosaic_0001>
module attributes {stable_mosaic.version = 11 : i64} {
  func.func @_mm_fused_kernel(%arg0: i32, %arg1: i32, %arg2: i32, %arg3: memref<256x147xbf16, #tpu.memory_space<vmem>>, %arg4: memref<147x128xbf16, #tpu.memory_space<vmem>>, %arg5: memref<1x128xf32, #tpu.memory_space<vmem>>, %arg6: memref<1x128xf32, #tpu.memory_space<vmem>>, %arg7: memref<256x128xbf16, #tpu.memory_space<vmem>>, %arg8: memref<256x128xf32, #tpu.memory_space<vmem>>) attributes {dimension_semantics = [#tpu.dimension_semantics<parallel>, #tpu.dimension_semantics<parallel>, #tpu.dimension_semantics<arbitrary>], iteration_bounds = array<i64: 1, 1, 1>, scalar_prefetch = 0 : i64, scratch_operands = 1 : i64, tpu.core_type = #tpu.core_type<tc>, window_params = [{transform_indices = @transform_0, window_bounds = array<i64: 256, 147>}, {transform_indices = @transform_1, window_bounds = array<i64: 147, 128>}, {transform_indices = @transform_2, window_bounds = array<i64: 1, 128>}, {transform_indices = @transform_3, window_bounds = array<i64: 1, 128>}, {transform_indices = @transform_4, window_bounds = array<i64: 256, 128>}]} {
    %c0_i32 = arith.constant 0 : i32
    %0 = arith.cmpi eq, %arg2, %c0_i32 : i32
    %1 = arith.extui %0 : i1 to i32
    %c0_i32_0 = arith.constant 0 : i32
    %2 = arith.cmpi ne, %1, %c0_i32_0 : i32
    scf.if %2 {
      %cst_10 = arith.constant 0.000000e+00 : f32
      %12 = vector.broadcast %cst_10 : f32 to vector<256x128xf32>
      %c0_11 = arith.constant 0 : index
      %c0_12 = arith.constant 0 : index
      %13 = vector.load %arg8[%c0_11, %c0_12] : memref<256x128xf32, #tpu.memory_space<vmem>>, vector<256x128xf32>
      tpu.vector_store %arg8[%c0_11, %c0_12], %12 {strides = array<i32>} : memref<256x128xf32, #tpu.memory_space<vmem>>, vector<256x128xf32>,
    } else {
    }
    %c0 = arith.constant 0 : index
    %c0_1 = arith.constant 0 : index
    %3 = vector.load %arg8[%c0, %c0_1] : memref<256x128xf32, #tpu.memory_space<vmem>>, vector<256x128xf32>
    %c0_2 = arith.constant 0 : index
    %c0_3 = arith.constant 0 : index
    %4 = vector.load %arg3[%c0_2, %c0_3] : memref<256x147xbf16, #tpu.memory_space<vmem>>, vector<256x147xbf16>
    %c0_4 = arith.constant 0 : index
    %c0_5 = arith.constant 0 : index
    %5 = vector.load %arg4[%c0_4, %c0_5] : memref<147x128xbf16, #tpu.memory_space<vmem>>, vector<147x128xbf16>
    %cst = arith.constant dense<0.000000e+00> : vector<256x128xf32>
    %6 = tpu.matmul %4, %5, %cst {dimension_numbers = #tpu.dot_dimension_numbers<[1], [0], [0], [1], [0, 0, 1, 1], [], []>} : vector<256x147xbf16>, vector<147x128xbf16>, vector<256x128xf32> -> vector<256x128xf32>
    %7 = arith.addf %3, %6 : vector<256x128xf32>
    %c0_6 = arith.constant 0 : index
    %c0_7 = arith.constant 0 : index
    %8 = vector.load %arg8[%c0_6, %c0_7] : memref<256x128xf32, #tpu.memory_space<vmem>>, vector<256x128xf32>
    tpu.vector_store %arg8[%c0_6, %c0_7], %7 {strides = array<i32>} : memref<256x128xf32, #tpu.memory_space<vmem>>, vector<256x128xf32>,
    %c0_i32_8 = arith.constant 0 : i32
    %9 = arith.cmpi eq, %arg2, %c0_i32_8 : i32
    %10 = arith.extui %9 : i1 to i32
    %c0_i32_9 = arith.constant 0 : i32
    %11 = arith.cmpi ne, %10, %c0_i32_9 : i32
    scf.if %11 {
      %c0_10 = arith.constant 0 : index
      %c0_11 = arith.constant 0 : index
      %12 = vector.load %arg8[%c0_10, %c0_11] : memref<256x128xf32, #tpu.memory_space<vmem>>, vector<256x128xf32>
      %c0_12 = arith.constant 0 : index
      %c0_13 = arith.constant 0 : index
      %13 = vector.load %arg5[%c0_12, %c0_13] : memref<1x128xf32, #tpu.memory_space<vmem>>, vector<1x128xf32>
      %14 = vector.broadcast %13 : vector<1x128xf32> to vector<256x128xf32>
      %15 = arith.mulf %12, %14 : vector<256x128xf32>
      %c0_14 = arith.constant 0 : index
      %c0_15 = arith.constant 0 : index
      %16 = vector.load %arg6[%c0_14, %c0_15] : memref<1x128xf32, #tpu.memory_space<vmem>>, vector<1x128xf32>
      %17 = vector.broadcast %16 : vector<1x128xf32> to vector<256x128xf32>
      %18 = arith.addf %15, %17 : vector<256x128xf32>
      %cst_16 = arith.constant 0.000000e+00 : f32
      %19 = vector.broadcast %cst_16 : f32 to vector<256x128xf32>
      %20 = arith.maximumf %18, %19 : vector<256x128xf32>
      %21 = arith.truncf %20 : vector<256x128xf32> to vector<256x128xbf16>
      %c0_17 = arith.constant 0 : index
      %c0_18 = arith.constant 0 : index
      %22 = vector.load %arg7[%c0_17, %c0_18] : memref<256x128xbf16, #tpu.memory_space<vmem>>, vector<256x128xbf16>
      tpu.vector_store %arg7[%c0_17, %c0_18], %21 {strides = array<i32>} : memref<256x128xbf16, #tpu.memory_space<vmem>>, vector<256x128xbf16>,
    } else {
    }
    return
  }
  func.func @transform_0(%arg0: i32, %arg1: i32, %arg2: i32) -> (i32, i32) {
    %c0_i32 = arith.constant 0 : i32
    return %arg0, %arg2 : i32, i32
  }
  func.func @transform_1(%arg0: i32, %arg1: i32, %arg2: i32) -> (i32, i32) {
    %c0_i32 = arith.constant 0 : i32
    return %arg2, %arg1 : i32, i32
  }
  func.func @transform_2(%arg0: i32, %arg1: i32, %arg2: i32) -> (i32, i32) {
    %c0_i32 = arith.constant 0 : i32
    %c0_i32_0 = arith.constant 0 : i32
    return %c0_i32, %arg1 : i32, i32
  }
  func.func @transform_3(%arg0: i32, %arg1: i32, %arg2: i32) -> (i32, i32) {
    %c0_i32 = arith.constant 0 : i32
    %c0_i32_0 = arith.constant 0 : i32
    return %c0_i32, %arg1 : i32, i32
  }
  func.func @transform_4(%arg0: i32, %arg1: i32, %arg2: i32) -> (i32, i32) {
    %c0_i32 = arith.constant 0 : i32
    return %arg0, %arg1 : i32, i32
  }
}

</mosaic_0001>

<bundles_post_ra>
// kernel: tpu_custom_call.1
= control target key start
LH: loop header
LB: loop body
LE: loop exit
PB: predicated region body
PF: predicated region fallthrough
CT: control target
= control target key end

     0   :  { %v1265_v1 = vmov 0   ;;  %vm339_vm0 = vcmask 154624   ;;  %vm388_vm1 = vcmask 1040384   ;;  %vm389_vm2 = vcmask 1041408   ;;  %s1514_s0 = inlined_call_operand.vmem [shape: bf16[256,147], index: 0, kind: input, shape index: {}]   ;;  %s1515_s1 = inlined_call_operand.vmem [shape: bf16[147,128], index: 1, kind: input, shape index: {}]   ;;  %s1516_s2 = inlined_call_operand.vmem [shape: f32[1,128], index: 2, kind: input, shape index: {}]   ;;  %s1517_s3 = inlined_call_operand.vmem [shape: f32[1,128], index: 3, kind: input, shape index: {}]   ;;  %s1518_s4 = inlined_call_operand.hbm [shape: bf16[256,128], index: 4, kind: output, shape index: {}]  }
   0x1   :  { %v1185_v0 = vld [vmem:[%s1515_s1 + $0x38] sm:$0xff]   ;;  %395 = vmatprep.subr.bf16.mxu0 %v1265_v1  ;;  %1160 = vmatprep.subr.bf16.mxu1 %v1265_v1  ;;  %v1186_v2 = vld [vmem:[%s1515_s1 + $0x30] sm:$0xff]   ;;  %v1187_v3 = vld [vmem:[%s1515_s1 + $0x28] sm:$0xff]   ;;  %v1266_v10 = vmov 65535  }
   0x2   :  { %396 = vmatpush1.bf16.msra.mxu0 %v1185_v0  ;;  %1170 = vmatpush1.bf16.msra.mxu1 %v1185_v0  ;;  %v1188_v4 = vld [vmem:[%s1515_s1 + $0x20] sm:$0xff]   ;;  %v1189_v7 = vld [vmem:[%s1515_s1 + $0x18] sm:$0xff]   ;;  %v1190_v8 = vld [vmem:[%s1515_s1 + $0x10] sm:$0xff]   ;;  %v390_v11 = vsel %vm388_vm1, 4294967295, %v1266_v10 }
   0x3   :  { %397 = vmatprep.subr.bf16.mxu0 %v1265_v1  ;;  %1161 = vmatprep.subr.bf16.mxu1 %v1265_v1  ;;  %v1197_v5 = vld [vmem:[%s1514_s0 + $0x4] ss:$8 sps:$4 sm:$0xff]   ;;  %v1193_v13 = vld [vmem:[%s1515_s1 + $0x48] ss:$0 sps:$4 sm:$0x33]   ;;  %v391_v14 = vsel %vm389_vm2, %v390_v11, 0 }
   0x4   :  { %983 = vmatprep.mubr.msk.bf16.mxu0 %vm339_vm0, %v1197_v5  ;;  %v1200_v6 = vld [vmem:[%s1514_s0 + $0x84] ss:$8 sps:$4 sm:$0xff]   ;;  %v393_v15 = vand.u32 %v1193_v13, %v391_v14 }
   0x5   :  { %991 = vmatprep.mubr.msk.bf16.mxu1 %vm339_vm0, %v1200_v6  ;;  %v1191_v9 = vld [vmem:[%s1515_s1 + $0x8] sm:$0xff]   ;;  %v1192_v12 = vld [vmem:[%s1515_s1] sm:$0xff]  }
   0x6   :  { %398 = vmatpush1.bf16.msra.mxu0 %v1186_v2  ;;  %1171 = vmatpush1.bf16.msra.mxu1 %v1186_v2 }
   0x7   :  { %399 = vmatprep.subr.bf16.mxu0 %v1265_v1  ;;  %1162 = vmatprep.subr.bf16.mxu1 %v1265_v1 }
   0xa   :  { %400 = vmatpush1.bf16.msra.mxu0 %v1187_v3  ;;  %1172 = vmatpush1.bf16.msra.mxu1 %v1187_v3 }
   0xb   :  { %401 = vmatprep.subr.bf16.mxu0 %v1265_v1  ;;  %1163 = vmatprep.subr.bf16.mxu1 %v1265_v1 }
   0xe   :  { %402 = vmatpush1.bf16.msra.mxu0 %v1188_v4  ;;  %1173 = vmatpush1.bf16.msra.mxu1 %v1188_v4 }
   0xf   :  { %403 = vmatprep.subr.bf16.mxu0 %v1265_v1  ;;  %1164 = vmatprep.subr.bf16.mxu1 %v1265_v1 }
  0x12   :  { %404 = vmatpush1.bf16.msra.mxu0 %v1189_v7  ;;  %1174 = vmatpush1.bf16.msra.mxu1 %v1189_v7 }
  0x13   :  { %405 = vmatprep.subr.bf16.mxu0 %v1265_v1  ;;  %1165 = vmatprep.subr.bf16.mxu1 %v1265_v1 }
  0x16   :  { %406 = vmatpush1.bf16.msra.mxu0 %v1190_v8  ;;  %1175 = vmatpush1.bf16.msra.mxu1 %v1190_v8 }
  0x17   :  { %407 = vmatprep.subr.bf16.mxu0 %v1265_v1  ;;  %1166 = vmatprep.subr.bf16.mxu1 %v1265_v1 }
  0x1a   :  { %408 = vmatpush1.bf16.msra.mxu0 %v1191_v9  ;;  %1176 = vmatpush1.bf16.msra.mxu1 %v1191_v9 }
  0x1b   :  { %409 = vmatprep.subr.bf16.mxu0 %v1265_v1  ;;  %1167 = vmatprep.subr.bf16.mxu1 %v1265_v1 }
  0x1e   :  { %410 = vmatpush1.bf16.msra.mxu0 %v1192_v12  ;;  %1177 = vmatpush1.bf16.msra.mxu1 %v1192_v12 }
  0x1f   :  { %423 = vmatprep.subr.bf16.mxu0 %v1265_v1  ;;  %1168 = vmatprep.subr.bf16.mxu1 %v1265_v1 }
  0x20   :  { %9 = vsyncpa [#allocation4], 0  ;;  %v1194_v16 = vld [vmem:[%s1515_s1 + $0x40] sm:$0xff]   ;;  %v1201_v19 = vld [vmem:[%s1514_s0 + $0x14] ss:$8 sps:$4 sm:$0xff]  }
  0x21   :  { %v1195_v17 = vld [vmem:[%s1514_s0] ss:$8 sps:$4 sm:$0xff]   ;;  %v1203_v20 = vld [vmem:[%s1514_s0 + $0x94] ss:$8 sps:$4 sm:$0xff]   ;;  %v1205_v21 = vld [vmem:[%s1514_s0 + $0x10] ss:$8 sps:$4 sm:$0xff]  }
  0x22   :  { %424 = vmatpush2.bf16.msra.mxu0 %v393_v15  ;;  %1178 = vmatpush2.bf16.msra.mxu1 %v393_v15  ;;  %v1198_v18 = vld [vmem:[%s1514_s0 + $0x80] ss:$8 sps:$4 sm:$0xff]   ;;  %v1206_v22 = vld [vmem:[%s1514_s0 + $0x90] ss:$8 sps:$4 sm:$0xff]   ;;  %v1207_v23 = vld [vmem:[%s1514_s0 + $0x24] ss:$8 sps:$4 sm:$0xff]  }
  0x23   :  { %425 = vmatprep.subr.bf16.mxu0 %v1265_v1  ;;  %1169 = vmatprep.subr.bf16.mxu1 %v1265_v1  ;;  %v1209_v24 = vld [vmem:[%s1514_s0 + $0xa4] ss:$8 sps:$4 sm:$0xff]   ;;  %v1211_v25 = vld [vmem:[%s1514_s0 + $0x20] ss:$8 sps:$4 sm:$0xff]   ;;  %v1213_v27 = vld [vmem:[%s1514_s0 + $0x34] ss:$8 sps:$4 sm:$0xff]  }
  0x24   :  { %v1212_v26 = vld [vmem:[%s1514_s0 + $0xa0] ss:$8 sps:$4 sm:$0xff]   ;;  %v1215_v28 = vld [vmem:[%s1514_s0 + $0xb4] ss:$8 sps:$4 sm:$0xff]   ;;  %v1217_v29 = vld [vmem:[%s1514_s0 + $0x30] ss:$8 sps:$4 sm:$0xff]  }
  0x25   :  { %v1218_v30 = vld [vmem:[%s1514_s0 + $0xb0] ss:$8 sps:$4 sm:$0xff]   ;;  %v1219_v31 = vld [vmem:[%s1514_s0 + $0x44] ss:$8 sps:$4 sm:$0xff]   ;;  %v1223_v33 = vld [vmem:[%s1514_s0 + $0x40] ss:$8 sps:$4 sm:$0xff]  }
  0x26   :  { %426 = vmatpush2.bf16.msra.mxu0 %v1194_v16  ;;  %1179 = vmatpush2.bf16.msra.mxu1 %v1194_v16  ;;  %v1221_v32 = vld [vmem:[%s1514_s0 + $0xc4] ss:$8 sps:$4 sm:$0xff]   ;;  %v1224_v34 = vld [vmem:[%s1514_s0 + $0xc0] ss:$8 sps:$4 sm:$0xff]   ;;  %v1225_v35 = vld [vmem:[%s1514_s0 + $0x54] ss:$8 sps:$4 sm:$0xff]  }
  0x27   :  { %v1227_v36 = vld [vmem:[%s1514_s0 + $0xd4] ss:$8 sps:$4 sm:$0xff]   ;;  %v1229_v37 = vld [vmem:[%s1514_s0 + $0x50] ss:$8 sps:$4 sm:$0xff]   ;;  %v1231_v39 = vld [vmem:[%s1514_s0 + $0x64] ss:$8 sps:$4 sm:$0xff]  }
  0x28   :  { %v1230_v38 = vld [vmem:[%s1514_s0 + $0xd0] ss:$8 sps:$4 sm:$0xff]   ;;  %v1233_v40 = vld [vmem:[%s1514_s0 + $0xe4] ss:$8 sps:$4 sm:$0xff]   ;;  %v1235_v41 = vld [vmem:[%s1514_s0 + $0x60] ss:$8 sps:$4 sm:$0xff]  }
  0x29   :  { %428 = vmatmul.mubr.bf16.vlgmr.msra.gmra.mxu0 %v1195_v17  ;;  %492 = vmatmul.mubr.bf16.vlgmr.msra.gmra.mxu1 %v1198_v18  ;;  %v1236_v42 = vld [vmem:[%s1514_s0 + $0xe0] ss:$8 sps:$4 sm:$0xff]   ;;  %v1237_v43 = vld [vmem:[%s1514_s0 + $0x74] ss:$8 sps:$4 sm:$0xff]   ;;  %v1241_v45 = vld [vmem:[%s1514_s0 + $0x70] ss:$8 sps:$4 sm:$0xff]  }
  0x2a   :  { %984 = vmatprep.mubr.msk.bf16.mxu0 %vm339_vm0, %v1201_v19  ;;  %992 = vmatprep.mubr.msk.bf16.mxu1 %vm339_vm0, %v1203_v20  ;;  %v1239_v44 = vld [vmem:[%s1514_s0 + $0xf4] ss:$8 sps:$4 sm:$0xff]   ;;  %v1242_v46 = vld [vmem:[%s1514_s0 + $0xf0] ss:$8 sps:$4 sm:$0xff]   ;;  %v1440_v47 = vld [vmem:[%s1516_s2] ss:$0 sm:$0xff] }
  0x2b   :  { %v1446_v51 = vld [vmem:[%s1517_s3] ss:$0 sm:$0xff]  ;;  %s1267_s0 = smov [#allocation3]  }
  0x2c   :  { %s930_s2 = sshll.u32 %s1267_s0, 4  ;;  %s931_s2 = int_to_ptr.vmem [resolvable:$true] %s930_s2 }
  0x2d   :  { %s1243_s3 = scalar_lea.vmem %s931_s2, 2048  ;;  %p1248_p1 = scmp.lt.s32.totalorder %s931_s2, %s931_s2 }
  0x2e   :  { %p1244_p0 = scmp.ne.s32.totalorder %s931_s2, %s1243_s3  ;;  %p1249_p2 = scmp.lt.s32.totalorder %s1243_s3, %s1243_s3 }
  0x30   :  { %p1250_p3 = por %p1249_p2, %p1248_p1 }
  0x31   :  { %436 = vmatmul.mubr.bf16.gmra.mxu0 %v1205_v21  ;;  %500 = vmatmul.mubr.bf16.gmra.mxu1 %v1206_v22 }
  0x32   :  { %985 = vmatprep.mubr.msk.bf16.mxu0 %vm339_vm0, %v1207_v23  ;;  %993 = vmatprep.mubr.msk.bf16.mxu1 %vm339_vm0, %v1209_v24  ;;  %p1251_p4 = pnand %p1250_p3, %p1244_p0 }
  0x39   :  { %444 = vmatmul.mubr.bf16.gmra.mxu0 %v1211_v25  ;;  %508 = vmatmul.mubr.bf16.gmra.mxu1 %v1212_v26 }
  0x3a   :  { %986 = vmatprep.mubr.msk.bf16.mxu0 %vm339_vm0, %v1213_v27  ;;  %994 = vmatprep.mubr.msk.bf16.mxu1 %vm339_vm0, %v1215_v28 }
  0x41   :  { %452 = vmatmul.mubr.bf16.gmra.mxu0 %v1217_v29  ;;  %516 = vmatmul.mubr.bf16.gmra.mxu1 %v1218_v30 }
  0x42   :  { %987 = vmatprep.mubr.msk.bf16.mxu0 %vm339_vm0, %v1219_v31  ;;  %995 = vmatprep.mubr.msk.bf16.mxu1 %vm339_vm0, %v1221_v32 }
  0x49   :  { %460 = vmatmul.mubr.bf16.gmra.mxu0 %v1223_v33  ;;  %524 = vmatmul.mubr.bf16.gmra.mxu1 %v1224_v34 }
  0x4a   :  { %988 = vmatprep.mubr.msk.bf16.mxu0 %vm339_vm0, %v1225_v35  ;;  %996 = vmatprep.mubr.msk.bf16.mxu1 %vm339_vm0, %v1227_v36 }
  0x51   :  { %468 = vmatmul.mubr.bf16.gmra.mxu0 %v1229_v37  ;;  %532 = vmatmul.mubr.bf16.gmra.mxu1 %v1230_v38 }
  0x52   :  { %989 = vmatprep.mubr.msk.bf16.mxu0 %vm339_vm0, %v1231_v39  ;;  %997 = vmatprep.mubr.msk.bf16.mxu1 %vm339_vm0, %v1233_v40 }
  0x59   :  { %476 = vmatmul.mubr.bf16.gmra.mxu0 %v1235_v41  ;;  %540 = vmatmul.mubr.bf16.gmra.mxu1 %v1236_v42 }
  0x5a   :  { %990 = vmatprep.mubr.msk.bf16.mxu0 %vm339_vm0, %v1237_v43  ;;  %998 = vmatprep.mubr.msk.bf16.mxu1 %vm339_vm0, %v1239_v44 }
  0x61   :  { %484 = vmatmul.mubr.bf16.gmra.mxu0 %v1241_v45  ;;  %548 = vmatmul.mubr.bf16.gmra.mxu1 %v1242_v46 }
  0xe9   :  { %v429_v48 = vpop.f32.mrf.mxu0  ;;  %v493_v49 = vpop.f32.mrf.mxu1 }
  0xea   :  { %v662_v50 = vmul.f32 %v1440_v47, %v429_v48  ;;  %v678_v52 = vmul.f32 %v1440_v47, %v493_v49 }
  0xeb   :  { %v431_v53 = vpop.f32.mrf.mxu0  ;;  %v495_v54 = vpop.f32.mrf.mxu1 }
  0xec   :  { %v701_v55 = vadd.f32 %v1446_v51, %v662_v50  ;;  %v717_v56 = vadd.f32 %v1446_v51, %v678_v52 }
  0xed   :  { %v432_v57 = vpop.f32.mrf.mxu0  ;;  %v496_v58 = vpop.f32.mrf.mxu1 }
  0xee   :  { %v663_v59 = vmul.f32 %v1440_v47, %v432_v57  ;;  %v679_v60 = vmul.f32 %v1440_v47, %v496_v58  ;;  %v733_v1 = vmax.f32 %v701_v55, 0.0  ;;  %v749_v2 = vmax.f32 %v717_v56, 0.0 }
  0xef   :  { %v434_v61 = vpop.f32.mrf.mxu0  ;;  %v498_v62 = vpop.f32.mrf.mxu1 }
  0xf0   :  { %v702_v63 = vadd.f32 %v1446_v51, %v663_v59  ;;  %v718_v0 = vadd.f32 %v1446_v51, %v679_v60 }
  0xf1   :  { %v437_v3 = vpop.f32.mrf.mxu0  ;;  %v501_v4 = vpop.f32.mrf.mxu1 }
  0xf2   :  { %v734_v5 = vmax.f32 %v702_v63, 0.0  ;;  %v750_v6 = vmax.f32 %v718_v0, 0.0  ;;  %v664_v7 = vmul.f32 %v1440_v47, %v437_v3  ;;  %v680_v8 = vmul.f32 %v1440_v47, %v501_v4 }
  0xf3   :  { %v439_v9 = vpop.f32.mrf.mxu0  ;;  %v503_v10 = vpop.f32.mrf.mxu1 }
  0xf4   :  { %v1068_v11 = vpack.c.bf16 %v734_v5, %v733_v1  ;;  %v1108_v12 = vpack.c.bf16 %v750_v6, %v749_v2  ;;  %v703_v13 = vadd.f32 %v1446_v51, %v664_v7  ;;  %v719_v14 = vadd.f32 %v1446_v51, %v680_v8 }
  0xf5   :  { %v440_v15 = vpop.f32.mrf.mxu0  ;;  %v504_v16 = vpop.f32.mrf.mxu1 }
  0xf6   :  { %1069 = vst [vmem:[#allocation3] sm:$0xff] %v1068_v11   ;;  %1152 = vst [vmem:[#allocation3 + $0x40] sm:$0xff] %v1108_v12   ;;  %v665_v17 = vmul.f32 %v1440_v47, %v440_v15  ;;  %v681_v18 = vmul.f32 %v1440_v47, %v504_v16  ;;  %v735_v23 = vmax.f32 %v703_v13, 0.0  ;;  %v751_v24 = vmax.f32 %v719_v14, 0.0 }
  0xf7   :  { %v442_v19 = vpop.f32.mrf.mxu0  ;;  %v506_v20 = vpop.f32.mrf.mxu1 }
  0xf8   :  { %v704_v21 = vadd.f32 %v1446_v51, %v665_v17  ;;  %v720_v22 = vadd.f32 %v1446_v51, %v681_v18 }
  0xf9   :  { %v445_v25 = vpop.f32.mrf.mxu0  ;;  %v509_v26 = vpop.f32.mrf.mxu1 }
  0xfa   :  { %v736_v27 = vmax.f32 %v704_v21, 0.0  ;;  %v752_v28 = vmax.f32 %v720_v22, 0.0  ;;  %v666_v29 = vmul.f32 %v1440_v47, %v445_v25  ;;  %v682_v30 = vmul.f32 %v1440_v47, %v509_v26 }
  0xfb   :  { %v447_v31 = vpop.f32.mrf.mxu0  ;;  %v511_v32 = vpop.f32.mrf.mxu1 }
  0xfc   :  { %v1073_v33 = vpack.c.bf16 %v736_v27, %v735_v23  ;;  %v1113_v34 = vpack.c.bf16 %v752_v28, %v751_v24  ;;  %v705_v35 = vadd.f32 %v1446_v51, %v666_v29  ;;  %v721_v36 = vadd.f32 %v1446_v51, %v682_v30 }
  0xfd   :  { %v448_v37 = vpop.f32.mrf.mxu0  ;;  %v512_v38 = vpop.f32.mrf.mxu1 }
  0xfe   :  { %1145 = vst [vmem:[#allocation3 + $0x8] sm:$0xff] %v1073_v33   ;;  %1153 = vst [vmem:[#allocation3 + $0x48] sm:$0xff] %v1113_v34   ;;  %v667_v39 = vmul.f32 %v1440_v47, %v448_v37  ;;  %v683_v40 = vmul.f32 %v1440_v47, %v512_v38  ;;  %v737_v45 = vmax.f32 %v705_v35, 0.0  ;;  %v753_v46 = vmax.f32 %v721_v36, 0.0 }
  0xff   :  { %v450_v41 = vpop.f32.mrf.mxu0  ;;  %v514_v42 = vpop.f32.mrf.mxu1 }
 0x100   :  { %v706_v43 = vadd.f32 %v1446_v51, %v667_v39  ;;  %v722_v44 = vadd.f32 %v1446_v51, %v683_v40 }
 0x101   :  { %v453_v48 = vpop.f32.mrf.mxu0  ;;  %v517_v49 = vpop.f32.mrf.mxu1 }
 0x102   :  { %v738_v50 = vmax.f32 %v706_v43, 0.0  ;;  %v754_v52 = vmax.f32 %v722_v44, 0.0  ;;  %v668_v53 = vmul.f32 %v1440_v47, %v453_v48  ;;  %v684_v54 = vmul.f32 %v1440_v47, %v517_v49 }
 0x103   :  { %v455_v55 = vpop.f32.mrf.mxu0  ;;  %v519_v56 = vpop.f32.mrf.mxu1 }
 0x104   :  { %v1078_v57 = vpack.c.bf16 %v738_v50, %v737_v45  ;;  %v1118_v58 = vpack.c.bf16 %v754_v52, %v753_v46  ;;  %v707_v59 = vadd.f32 %v1446_v51, %v668_v53  ;;  %v723_v60 = vadd.f32 %v1446_v51, %v684_v54 }
 0x105   :  { %v456_v61 = vpop.f32.mrf.mxu0  ;;  %v520_v62 = vpop.f32.mrf.mxu1 }
 0x106   :  { %1146 = vst [vmem:[#allocation3 + $0x10] sm:$0xff] %v1078_v57   ;;  %1154 = vst [vmem:[#allocation3 + $0x50] sm:$0xff] %v1118_v58   ;;  %v669_v63 = vmul.f32 %v1440_v47, %v456_v61  ;;  %v685_v0 = vmul.f32 %v1440_v47, %v520_v62  ;;  %v739_v5 = vmax.f32 %v707_v59, 0.0  ;;  %v755_v6 = vmax.f32 %v723_v60, 0.0 }
 0x107   :  { %v458_v1 = vpop.f32.mrf.mxu0  ;;  %v522_v2 = vpop.f32.mrf.mxu1 }
 0x108   :  { %v708_v3 = vadd.f32 %v1446_v51, %v669_v63  ;;  %v724_v4 = vadd.f32 %v1446_v51, %v685_v0 }
 0x109   :  { %v461_v7 = vpop.f32.mrf.mxu0  ;;  %v525_v8 = vpop.f32.mrf.mxu1 }
 0x10a   :  { %v740_v9 = vmax.f32 %v708_v3, 0.0  ;;  %v756_v10 = vmax.f32 %v724_v4, 0.0  ;;  %v670_v11 = vmul.f32 %v1440_v47, %v461_v7  ;;  %v686_v12 = vmul.f32 %v1440_v47, %v525_v8 }
 0x10b   :  { %v463_v13 = vpop.f32.mrf.mxu0  ;;  %v527_v14 = vpop.f32.mrf.mxu1 }
 0x10c   :  { %v1083_v15 = vpack.c.bf16 %v740_v9, %v739_v5  ;;  %v1123_v16 = vpack.c.bf16 %v756_v10, %v755_v6  ;;  %v709_v17 = vadd.f32 %v1446_v51, %v670_v11  ;;  %v725_v18 = vadd.f32 %v1446_v51, %v686_v12 }
 0x10d   :  { %v464_v19 = vpop.f32.mrf.mxu0  ;;  %v528_v20 = vpop.f32.mrf.mxu1 }
 0x10e   :  { %1147 = vst [vmem:[#allocation3 + $0x18] sm:$0xff] %v1083_v15   ;;  %1155 = vst [vmem:[#allocation3 + $0x58] sm:$0xff] %v1123_v16   ;;  %v671_v21 = vmul.f32 %v1440_v47, %v464_v19  ;;  %v687_v22 = vmul.f32 %v1440_v47, %v528_v20  ;;  %v741_v27 = vmax.f32 %v709_v17, 0.0  ;;  %v757_v28 = vmax.f32 %v725_v18, 0.0 }
 0x10f   :  { %v466_v23 = vpop.f32.mrf.mxu0  ;;  %v530_v24 = vpop.f32.mrf.mxu1 }
 0x110   :  { %v710_v25 = vadd.f32 %v1446_v51, %v671_v21  ;;  %v726_v26 = vadd.f32 %v1446_v51, %v687_v22 }
 0x111   :  { %v469_v29 = vpop.f32.mrf.mxu0  ;;  %v533_v30 = vpop.f32.mrf.mxu1 }
 0x112   :  { %v742_v31 = vmax.f32 %v710_v25, 0.0  ;;  %v758_v32 = vmax.f32 %v726_v26, 0.0  ;;  %v672_v33 = vmul.f32 %v1440_v47, %v469_v29  ;;  %v688_v34 = vmul.f32 %v1440_v47, %v533_v30 }
 0x113   :  { %v471_v35 = vpop.f32.mrf.mxu0  ;;  %v535_v36 = vpop.f32.mrf.mxu1 }
 0x114   :  { %v1088_v37 = vpack.c.bf16 %v742_v31, %v741_v27  ;;  %v1128_v38 = vpack.c.bf16 %v758_v32, %v757_v28  ;;  %v711_v39 = vadd.f32 %v1446_v51, %v672_v33  ;;  %v727_v40 = vadd.f32 %v1446_v51, %v688_v34 }
 0x115   :  { %v472_v41 = vpop.f32.mrf.mxu0  ;;  %v536_v42 = vpop.f32.mrf.mxu1 }
 0x116   :  { %1148 = vst [vmem:[#allocation3 + $0x20] sm:$0xff] %v1088_v37   ;;  %1156 = vst [vmem:[#allocation3 + $0x60] sm:$0xff] %v1128_v38   ;;  %v673_v43 = vmul.f32 %v1440_v47, %v472_v41  ;;  %v689_v44 = vmul.f32 %v1440_v47, %v536_v42  ;;  %v743_v50 = vmax.f32 %v711_v39, 0.0  ;;  %v759_v52 = vmax.f32 %v727_v40, 0.0 }
 0x117   :  { %v474_v45 = vpop.f32.mrf.mxu0  ;;  %v538_v46 = vpop.f32.mrf.mxu1 }
 0x118   :  { %v712_v48 = vadd.f32 %v1446_v51, %v673_v43  ;;  %v728_v49 = vadd.f32 %v1446_v51, %v689_v44 }
 0x119   :  { %v477_v53 = vpop.f32.mrf.mxu0  ;;  %v541_v54 = vpop.f32.mrf.mxu1 }
 0x11a   :  { %v744_v55 = vmax.f32 %v712_v48, 0.0  ;;  %v760_v56 = vmax.f32 %v728_v49, 0.0  ;;  %v674_v57 = vmul.f32 %v1440_v47, %v477_v53  ;;  %v690_v58 = vmul.f32 %v1440_v47, %v541_v54 }
 0x11b   :  { %v479_v59 = vpop.f32.mrf.mxu0  ;;  %v543_v60 = vpop.f32.mrf.mxu1 }
 0x11c   :  { %v1093_v61 = vpack.c.bf16 %v744_v55, %v743_v50  ;;  %v1133_v62 = vpack.c.bf16 %v760_v56, %v759_v52  ;;  %v713_v63 = vadd.f32 %v1446_v51, %v674_v57  ;;  %v729_v0 = vadd.f32 %v1446_v51, %v690_v58 }
 0x11d   :  { %v480_v1 = vpop.f32.mrf.mxu0  ;;  %v544_v2 = vpop.f32.mrf.mxu1 }
 0x11e   :  { %1149 = vst [vmem:[#allocation3 + $0x28] sm:$0xff] %v1093_v61   ;;  %1157 = vst [vmem:[#allocation3 + $0x68] sm:$0xff] %v1133_v62   ;;  %v675_v3 = vmul.f32 %v1440_v47, %v480_v1  ;;  %v691_v4 = vmul.f32 %v1440_v47, %v544_v2  ;;  %v745_v9 = vmax.f32 %v713_v63, 0.0  ;;  %v761_v10 = vmax.f32 %v729_v0, 0.0 }
 0x11f   :  { %v482_v5 = vpop.f32.mrf.mxu0  ;;  %v546_v6 = vpop.f32.mrf.mxu1 }
 0x120   :  { %v714_v7 = vadd.f32 %v1446_v51, %v675_v3  ;;  %v730_v8 = vadd.f32 %v1446_v51, %v691_v4 }
 0x121   :  { %v485_v11 = vpop.f32.mrf.mxu0  ;;  %v549_v12 = vpop.f32.mrf.mxu1 }
 0x122   :  { %v746_v13 = vmax.f32 %v714_v7, 0.0  ;;  %v762_v14 = vmax.f32 %v730_v8, 0.0  ;;  %v676_v15 = vmul.f32 %v1440_v47, %v485_v11  ;;  %v692_v16 = vmul.f32 %v1440_v47, %v549_v12 }
 0x123   :  { %v487_v17 = vpop.f32.mrf.mxu0  ;;  %v551_v18 = vpop.f32.mrf.mxu1 }
 0x124   :  { %v1098_v19 = vpack.c.bf16 %v746_v13, %v745_v9  ;;  %v1138_v20 = vpack.c.bf16 %v762_v14, %v761_v10  ;;  %v715_v23 = vadd.f32 %v1446_v51, %v676_v15  ;;  %v731_v24 = vadd.f32 %v1446_v51, %v692_v16 }
 0x125   :  { %v488_v21 = vpop.f32.mrf.mxu0  ;;  %v552_v22 = vpop.f32.mrf.mxu1 }
 0x126   :  { %1150 = vst [vmem:[#allocation3 + $0x30] sm:$0xff] %v1098_v19   ;;  %1158 = vst [vmem:[#allocation3 + $0x70] sm:$0xff] %v1138_v20   ;;  %v677_v25 = vmul.f32 %v1440_v47, %v488_v21  ;;  %v693_v26 = vmul.f32 %v1440_v47, %v552_v22  ;;  %v747_v31 = vmax.f32 %v715_v23, 0.0  ;;  %v763_v32 = vmax.f32 %v731_v24, 0.0 }
 0x127   :  { %v490_v27 = vpop.f32.mrf.mxu0  ;;  %v554_v28 = vpop.f32.mrf.mxu1 }
 0x128   :  { %v716_v29 = vadd.f32 %v1446_v51, %v677_v25  ;;  %v732_v30 = vadd.f32 %v1446_v51, %v693_v26 }
 0x12a   :  { %v748_v33 = vmax.f32 %v716_v29, 0.0  ;;  %v764_v34 = vmax.f32 %v732_v30, 0.0 }
 0x12c   :  { %v1103_v35 = vpack.c.bf16 %v748_v33, %v747_v31  ;;  %v1143_v36 = vpack.c.bf16 %v764_v34, %v763_v32 }
 0x12e   :  { %1151 = vst [vmem:[#allocation3 + $0x38] sm:$0xff] %v1103_v35   ;;  %1159 = vst [vmem:[#allocation3 + $0x78] sm:$0xff] %v1143_v36  }
 0x12f   :  { %1254 = shalt.err (!%p1251_p4)
}
 0x130   :  { %s1268_s22 = smov 64   ;;  %s1269_s23 = smov 4  }
 0x131   :  { %936 = dma.vmem_to_hbm [thread:$0]  %s931_s2, 2048, %s1518_s4, [#allocation4], %s1268_s22, %s1268_s22, %s1269_s23  }
 0x132   :  { %1263 = dma.done.wait [#allocation4], 2048  }
 0x133   :  { %1264 = vsyncadd [#allocation4], 4294965248 }
 0x134   :  { %940 = vsyncpa [#allocation4], 1 }

</bundles_post_ra>
